<compile_context>
chip_gen: v5e
topology: v5e:2x2
jax: 0.10.0
libtpu: 0.0.40
codegen_flags: <defaults>
</compile_context>

<pallas_src>
import functools

import jax
import jax.numpy as jnp
from jax.experimental import pallas as pl
from jax.experimental.pallas import tpu as pltpu


def gru_kernel(x_ref,       # (T*Bp, Ip)  time-major, flattened, zero-padded input
               w_i_ref,     # (Ip, 3H)    fused input weights  [z|r|n]
               w_h_ref,     # (H, 3H)     fused hidden weights [z|r|n]
               b_i_ref,     # (1, 3H)     fused bias: [b_iz+b_hz | b_ir+b_hr | b_in]
               b_hn_ref,    # (1, H)      hidden-side n bias (gated by r)
               w_fc_ref,    # (H, C)
               b_fc_ref,    # (1, C)
               out_ref,     # (Bp, C)
               *, T, Bp, H):
    # ---- Hoisted input projection: one big MXU matmul covering all timesteps,
    #      kept as an SSA value (vreg-resident; no VMEM scratch round-trip). ----
    xproj = (jnp.dot(x_ref[...], w_i_ref[...], preferred_element_type=jnp.float32)
             + b_i_ref[...])                                        # (T*Bp, 3H)

    w_h = w_h_ref[...]                                              # (H, 3H), loaded once
    # Hoist the (1,H)->(Bp,H) broadcast out of the loop (JAX doesn't CSE it).
    b_hn = jnp.broadcast_to(b_hn_ref[...], (Bp, H))

    # ---- Recurrence: fully unrolled (T small & static); slices are static and
    #      sublane-aligned (Bp is a multiple of 8).  Only h @ W_h is serial.
    #      NOTE: if the bundle dump shows W_h re-pushed to the MXU every step,
    #      switch to pltpu.matmul_push_rhs (once) + matmul_acc_lhs/matmul_pop. ----
    h = jnp.zeros((Bp, H), jnp.float32)
    for t in range(T):
        xp = xproj[t * Bp:(t + 1) * Bp, :]                          # (Bp, 3H)
        hp = jnp.dot(h, w_h, preferred_element_type=jnp.float32)    # (Bp, 3H)
        # Gate order (z, r, n); hidden-side z/r biases pre-folded into b_i.
        #   z = sigmoid(W_iz x + b_iz + W_hz h + b_hz)
        #   r = sigmoid(W_ir x + b_ir + W_hr h + b_hr)
        #   n = tanh  (W_in x + b_in + r * (W_hn h + b_hn))
        #   h = (1 - z) * n + z * h_prev
        z = jax.nn.sigmoid(xp[:, :H] + hp[:, :H])
        r = jax.nn.sigmoid(xp[:, H:2 * H] + hp[:, H:2 * H])
        n = jnp.tanh(xp[:, 2 * H:] + r * (hp[:, 2 * H:] + b_hn))
        h = (1.0 - z) * n + z * h

    # ---- Epilogue: fc + exact softmax over classes on the last hidden state. ----
    logits = (jnp.dot(h, w_fc_ref[...], preferred_element_type=jnp.float32)
              + b_fc_ref[...])                                      # (Bp, C)
    m = jnp.max(logits, axis=-1, keepdims=True)
    e = jnp.exp(logits - m)
    out_ref[...] = e / jnp.sum(e, axis=-1, keepdims=True)


@jax.jit
def gru_forward(x, params):
    """x: (B, T, I) batch-first (PyTorch convention). Returns (B, num_classes) softmax probs."""
    B, T, I = x.shape
    H = params["w_h"].shape[0]
    C = params["w_fc"].shape[1]
    Ip = params["w_i"].shape[0]          # padded contraction size
    Bp = ((B + 7) // 8) * 8              # pad batch to a full sublane group

    # Time-major + zero-pad batch/contraction.  allow_input_fusion lets XLA fuse
    # this transpose/pad/reshape into the kernel's input DMA instead of a
    # separate HBM round-trip (the biggest end-to-end win at this tiny size).
    x_tm = jnp.transpose(x, (1, 0, 2))                               # (T, B, I)
    x_pad = jnp.pad(x_tm, ((0, 0), (0, Bp - B), (0, Ip - I)))        # (T, Bp, Ip)
    x_flat = x_pad.reshape(T * Bp, Ip)

    vmem = pl.BlockSpec(memory_space=pltpu.MemorySpace.VMEM)
    kernel = functools.partial(gru_kernel, T=T, Bp=Bp, H=H)

    out = pl.pallas_call(
        kernel,
        out_shape=jax.ShapeDtypeStruct((Bp, C), jnp.float32),
        in_specs=[vmem] * 7,
        out_specs=vmem,
        compiler_params=pltpu.CompilerParams(
            allow_input_fusion=[True, False, False, False, False, False, False]),
    )(x_flat, params["w_i"], params["w_h"], params["b_i"], params["b_hn"],
      params["w_fc"], params["b_fc"])

    # Padded batch rows compute harmless finite junk; drop them here.
    return out[:B]


def init_params(key, input_size=46, hidden_size=64, num_classes=8):
    """Deterministic init matching PyTorch shapes (uniform +-1/sqrt(H)).

    Returns the fused/padded kernel layout plus the raw unfused PyTorch-style
    weights (gate order r,z,n) for the reference check.
    """
    H, I, C = hidden_size, input_size, num_classes
    Ip = ((I + 7) // 8) * 8                       # pad contraction dim to sublane multiple
    k = 1.0 / (H ** 0.5)
    keys = jax.random.split(key, 12)
    u = lambda kk, shape: jax.random.uniform(kk, shape, jnp.float32, -k, k)

    # nn.GRU weight_ih_l0 is (3H, I) gate order (r, z, n); stored transposed here.
    w_ir, w_iz, w_in = u(keys[0], (I, H)), u(keys[1], (I, H)), u(keys[2], (I, H))
    w_hr, w_hz, w_hn = u(keys[3], (H, H)), u(keys[4], (H, H)), u(keys[5], (H, H))
    b_ir, b_iz, b_in = u(keys[6], (1, H)), u(keys[7], (1, H)), u(keys[8], (1, H))
    b_hr, b_hz, b_hn = u(keys[9], (1, H)), u(keys[10], (1, H)), u(keys[11], (1, H))

    # Fused kernel layout, gate order (z, r, n) for lane alignment.  Hidden-side
    # z/r biases folded into the input-side fused bias; b_hn must stay
    # hidden-side because it is gated by r inside tanh.
    w_i = jnp.concatenate([w_iz, w_ir, w_in], axis=1)                 # (I, 3H)
    w_i = jnp.pad(w_i, ((0, Ip - I), (0, 0)))                         # (Ip, 3H), zero rows
    w_h = jnp.concatenate([w_hz, w_hr, w_hn], axis=1)                 # (H, 3H)
    b_i = jnp.concatenate([b_iz + b_hz, b_ir + b_hr, b_in], axis=1)   # (1, 3H)

    kfc1, kfc2 = jax.random.split(jax.random.fold_in(key, 123))
    w_fc = jax.random.uniform(kfc1, (H, C), jnp.float32, -k, k)
    b_fc = jax.random.uniform(kfc2, (1, C), jnp.float32, -k, k)

    raw = dict(w_ir=w_ir, w_iz=w_iz, w_in=w_in, w_hr=w_hr, w_hz=w_hz, w_hn=w_hn,
               b_ir=b_ir, b_iz=b_iz, b_in=b_in, b_hr=b_hr, b_hz=b_hz, b_hn=b_hn)
    return dict(w_i=w_i, w_h=w_h, b_i=b_i, b_hn=b_hn, w_fc=w_fc, b_fc=b_fc, raw=raw)


def gru_reference(x, params):
    """Pure-JAX reference using the RAW unfused PyTorch-style weights (gate order r,z,n).

    Validates the fused/reordered/bias-folded kernel layout against the original
    nn.GRU equations.  Run at highest matmul precision so the f32 reference
    matches the kernel's exact-f32 MXU path.
    """
    raw = params["raw"]
    B, T, I = x.shape
    H = raw["w_hr"].shape[0]

    with jax.default_matmul_precision("highest"):
        def step(h, x_t):
            r = jax.nn.sigmoid(x_t @ raw["w_ir"] + raw["b_ir"] + h @ raw["w_hr"] + raw["b_hr"])
            z = jax.nn.sigmoid(x_t @ raw["w_iz"] + raw["b_iz"] + h @ raw["w_hz"] + raw["b_hz"])
            n = jnp.tanh(x_t @ raw["w_in"] + raw["b_in"] + r * (h @ raw["w_hn"] + raw["b_hn"]))
            return (1.0 - z) * n + z * h, None

        h0 = jnp.zeros((B, H), jnp.float32)
        h_last, _ = jax.lax.scan(step, h0, jnp.transpose(x, (1, 0, 2)))
        logits = h_last @ params["w_fc"] + params["b_fc"]
        return jax.nn.softmax(logits, axis=1)


if __name__ == "__main__":
    key = jax.random.PRNGKey(0)
    kx, kp = jax.random.split(key)

    B, T, I = 2, 8, 46          # batch=2, seq=8, input_size=46 (module default)
    x = jax.random.normal(kx, (B, T, I), jnp.float32)
    params = init_params(kp, input_size=I, hidden_size=64, num_classes=8)

    out = jax.block_until_ready(gru_forward(x, params))
    ref = gru_reference(x, params)

    assert out.shape == (B, 8)
    assert bool(jnp.all(jnp.isfinite(out)))
    assert jnp.allclose(out, ref, atol=1e-5, rtol=1e-5), (out, ref)

    print("KERNEL_OK")
</pallas_src>

<mosaic_0001>
module attributes {stable_mosaic.version = 11 : i64} {
  func.func @gru_kernel(%arg0: memref<64x48xf32, #tpu.memory_space<vmem>>, %arg1: memref<48x192xf32, #tpu.memory_space<vmem>>, %arg2: memref<64x192xf32, #tpu.memory_space<vmem>>, %arg3: memref<1x192xf32, #tpu.memory_space<vmem>>, %arg4: memref<1x64xf32, #tpu.memory_space<vmem>>, %arg5: memref<64x8xf32, #tpu.memory_space<vmem>>, %arg6: memref<1x8xf32, #tpu.memory_space<vmem>>, %arg7: memref<8x8xf32, #tpu.memory_space<vmem>>) attributes {dimension_semantics = [], scalar_prefetch = 0 : i64, scratch_operands = 0 : i64, tpu.core_type = #tpu.core_type<tc>} {
    %c0 = arith.constant 0 : index
    %c0_0 = arith.constant 0 : index
    %0 = vector.load %arg0[%c0, %c0_0] : memref<64x48xf32, #tpu.memory_space<vmem>>, vector<64x48xf32>
    %c0_1 = arith.constant 0 : index
    %c0_2 = arith.constant 0 : index
    %1 = vector.load %arg1[%c0_1, %c0_2] : memref<48x192xf32, #tpu.memory_space<vmem>>, vector<48x192xf32>
    %cst = arith.constant dense<0.000000e+00> : vector<64x192xf32>
    %2 = tpu.matmul %0, %1, %cst {dimension_numbers = #tpu.dot_dimension_numbers<[1], [0], [0], [1], [0, 0, 1, 1], [], []>} : vector<64x48xf32>, vector<48x192xf32>, vector<64x192xf32> -> vector<64x192xf32>
    %c0_3 = arith.constant 0 : index
    %c0_4 = arith.constant 0 : index
    %3 = vector.load %arg3[%c0_3, %c0_4] : memref<1x192xf32, #tpu.memory_space<vmem>>, vector<1x192xf32>
    %4 = vector.broadcast %3 : vector<1x192xf32> to vector<64x192xf32>
    %5 = arith.addf %2, %4 : vector<64x192xf32>
    %c0_5 = arith.constant 0 : index
    %c0_6 = arith.constant 0 : index
    %6 = vector.load %arg2[%c0_5, %c0_6] : memref<64x192xf32, #tpu.memory_space<vmem>>, vector<64x192xf32>
    %c0_7 = arith.constant 0 : index
    %c0_8 = arith.constant 0 : index
    %7 = vector.load %arg4[%c0_7, %c0_8] : memref<1x64xf32, #tpu.memory_space<vmem>>, vector<1x64xf32>
    %8 = vector.shape_cast %7 : vector<1x64xf32> to vector<1x64xf32>
    %9 = vector.broadcast %8 : vector<1x64xf32> to vector<8x64xf32>
    %cst_9 = arith.constant 0.000000e+00 : f32
    %10 = vector.broadcast %cst_9 : f32 to vector<8x64xf32>
    %11 = vector.extract_strided_slice %5 {offsets = [0, 0], sizes = [8, 192], strides = [1, 1]} : vector<64x192xf32> to vector<8x192xf32>
    %cst_10 = arith.constant dense<0.000000e+00> : vector<8x192xf32>
    %12 = tpu.matmul %10, %6, %cst_10 {dimension_numbers = #tpu.dot_dimension_numbers<[1], [0], [0], [1], [0, 0, 1, 1], [], []>} : vector<8x64xf32>, vector<64x192xf32>, vector<8x192xf32> -> vector<8x192xf32>
    %13 = vector.extract_strided_slice %11 {offsets = [0, 0], sizes = [8, 64], strides = [1, 1]} : vector<8x192xf32> to vector<8x64xf32>
    %14 = vector.extract_strided_slice %12 {offsets = [0, 0], sizes = [8, 64], strides = [1, 1]} : vector<8x192xf32> to vector<8x64xf32>
    %15 = arith.addf %13, %14 : vector<8x64xf32>
    %16 = arith.negf %15 : vector<8x64xf32>
    %17 = math.exp %16 : vector<8x64xf32>
    %cst_11 = arith.constant 1.000000e+00 : f32
    %18 = vector.broadcast %cst_11 : f32 to vector<8x64xf32>
    %19 = arith.addf %18, %17 : vector<8x64xf32>
    %20 = arith.divf %18, %19 : vector<8x64xf32>
    %21 = vector.extract_strided_slice %11 {offsets = [0, 64], sizes = [8, 64], strides = [1, 1]} : vector<8x192xf32> to vector<8x64xf32>
    %22 = vector.extract_strided_slice %12 {offsets = [0, 64], sizes = [8, 64], strides = [1, 1]} : vector<8x192xf32> to vector<8x64xf32>
    %23 = arith.addf %21, %22 : vector<8x64xf32>
    %24 = arith.negf %23 : vector<8x64xf32>
    %25 = math.exp %24 : vector<8x64xf32>
    %cst_12 = arith.constant 1.000000e+00 : f32
    %26 = vector.broadcast %cst_12 : f32 to vector<8x64xf32>
    %27 = arith.addf %26, %25 : vector<8x64xf32>
    %28 = arith.divf %26, %27 : vector<8x64xf32>
    %29 = vector.extract_strided_slice %11 {offsets = [0, 128], sizes = [8, 64], strides = [1, 1]} : vector<8x192xf32> to vector<8x64xf32>
    %30 = vector.extract_strided_slice %12 {offsets = [0, 128], sizes = [8, 64], strides = [1, 1]} : vector<8x192xf32> to vector<8x64xf32>
    %31 = arith.addf %30, %9 : vector<8x64xf32>
    %32 = arith.mulf %28, %31 : vector<8x64xf32>
    %33 = arith.addf %29, %32 : vector<8x64xf32>
    %34 = math.tanh %33 : vector<8x64xf32>
    %cst_13 = arith.constant 1.000000e+00 : f32
    %35 = vector.broadcast %cst_13 : f32 to vector<8x64xf32>
    %36 = arith.subf %35, %20 : vector<8x64xf32>
    %37 = arith.mulf %36, %34 : vector<8x64xf32>
    %38 = arith.mulf %20, %10 : vector<8x64xf32>
    %39 = arith.addf %37, %38 : vector<8x64xf32>
    %40 = vector.extract_strided_slice %5 {offsets = [8, 0], sizes = [8, 192], strides = [1, 1]} : vector<64x192xf32> to vector<8x192xf32>
    %cst_14 = arith.constant dense<0.000000e+00> : vector<8x192xf32>
    %41 = tpu.matmul %39, %6, %cst_14 {dimension_numbers = #tpu.dot_dimension_numbers<[1], [0], [0], [1], [0, 0, 1, 1], [], []>} : vector<8x64xf32>, vector<64x192xf32>, vector<8x192xf32> -> vector<8x192xf32>
    %42 = vector.extract_strided_slice %40 {offsets = [0, 0], sizes = [8, 64], strides = [1, 1]} : vector<8x192xf32> to vector<8x64xf32>
    %43 = vector.extract_strided_slice %41 {offsets = [0, 0], sizes = [8, 64], strides = [1, 1]} : vector<8x192xf32> to vector<8x64xf32>
    %44 = arith.addf %42, %43 : vector<8x64xf32>
    %45 = arith.negf %44 : vector<8x64xf32>
    %46 = math.exp %45 : vector<8x64xf32>
    %cst_15 = arith.constant 1.000000e+00 : f32
    %47 = vector.broadcast %cst_15 : f32 to vector<8x64xf32>
    %48 = arith.addf %47, %46 : vector<8x64xf32>
    %49 = arith.divf %47, %48 : vector<8x64xf32>
    %50 = vector.extract_strided_slice %40 {offsets = [0, 64], sizes = [8, 64], strides = [1, 1]} : vector<8x192xf32> to vector<8x64xf32>
    %51 = vector.extract_strided_slice %41 {offsets = [0, 64], sizes = [8, 64], strides = [1, 1]} : vector<8x192xf32> to vector<8x64xf32>
    %52 = arith.addf %50, %51 : vector<8x64xf32>
    %53 = arith.negf %52 : vector<8x64xf32>
    %54 = math.exp %53 : vector<8x64xf32>
    %cst_16 = arith.constant 1.000000e+00 : f32
    %55 = vector.broadcast %cst_16 : f32 to vector<8x64xf32>
    %56 = arith.addf %55, %54 : vector<8x64xf32>
    %57 = arith.divf %55, %56 : vector<8x64xf32>
    %58 = vector.extract_strided_slice %40 {offsets = [0, 128], sizes = [8, 64], strides = [1, 1]} : vector<8x192xf32> to vector<8x64xf32>
    %59 = vector.extract_strided_slice %41 {offsets = [0, 128], sizes = [8, 64], strides = [1, 1]} : vector<8x192xf32> to vector<8x64xf32>
    %60 = arith.addf %59, %9 : vector<8x64xf32>
    %61 = arith.mulf %57, %60 : vector<8x64xf32>
    %62 = arith.addf %58, %61 : vector<8x64xf32>
    %63 = math.tanh %62 : vector<8x64xf32>
    %cst_17 = arith.constant 1.000000e+00 : f32
    %64 = vector.broadcast %cst_17 : f32 to vector<8x64xf32>
    %65 = arith.subf %64, %49 : vector<8x64xf32>
    %66 = arith.mulf %65, %63 : vector<8x64xf32>
    %67 = arith.mulf %49, %39 : vector<8x64xf32>
    %68 = arith.addf %66, %67 : vector<8x64xf32>
    %69 = vector.extract_strided_slice %5 {offsets = [16, 0], sizes = [8, 192], strides = [1, 1]} : vector<64x192xf32> to vector<8x192xf32>
    %cst_18 = arith.constant dense<0.000000e+00> : vector<8x192xf32>
    %70 = tpu.matmul %68, %6, %cst_18 {dimension_numbers = #tpu.dot_dimension_numbers<[1], [0], [0], [1], [0, 0, 1, 1], [], []>} : vector<8x64xf32>, vector<64x192xf32>, vector<8x192xf32> -> vector<8x192xf32>
    %71 = vector.extract_strided_slice %69 {offsets = [0, 0], sizes = [8, 64], strides = [1, 1]} : vector<8x192xf32> to vector<8x64xf32>
    %72 = vector.extract_strided_slice %70 {offsets = [0, 0], sizes = [8, 64], strides = [1, 1]} : vector<8x192xf32> to vector<8x64xf32>
    %73 = arith.addf %71, %72 : vector<8x64xf32>
    %74 = arith.negf %73 : vector<8x64xf32>
    %75 = math.exp %74 : vector<8x64xf32>
    %cst_19 = arith.constant 1.000000e+00 : f32
    %76 = vector.broadcast %cst_19 : f32 to vector<8x64xf32>
    %77 = arith.addf %76, %75 : vector<8x64xf32>
    %78 = arith.divf %76, %77 : vector<8x64xf32>
    %79 = vector.extract_strided_slice %69 {offsets = [0, 64], sizes = [8, 64], strides = [1, 1]} : vector<8x192xf32> to vector<8x64xf32>
    %80 = vector.extract_strided_slice %70 {offsets = [0, 64], sizes = [8, 64], strides = [1, 1]} : vector<8x192xf32> to vector<8x64xf32>
    %81 = arith.addf %79, %80 : vector<8x64xf32>
    %82 = arith.negf %81 : vector<8x64xf32>
    %83 = math.exp %82 : vector<8x64xf32>
    %cst_20 = arith.constant 1.000000e+00 : f32
    %84 = vector.broadcast %cst_20 : f32 to vector<8x64xf32>
    %85 = arith.addf %84, %83 : vector<8x64xf32>
    %86 = arith.divf %84, %85 : vector<8x64xf32>
    %87 = vector.extract_strided_slice %69 {offsets = [0, 128], sizes = [8, 64], strides = [1, 1]} : vector<8x192xf32> to vector<8x64xf32>
    %88 = vector.extract_strided_slice %70 {offsets = [0, 128], sizes = [8, 64], strides = [1, 1]} : vector<8x192xf32> to vector<8x64xf32>
    %89 = arith.addf %88, %9 : vector<8x64xf32>
    %90 = arith.mulf %86, %89 : vector<8x64xf32>
    %91 = arith.addf %87, %90 : vector<8x64xf32>
    %92 = math.tanh %91 : vector<8x64xf32>
    %cst_21 = arith.constant 1.000000e+00 : f32
    %93 = vector.broadcast %cst_21 : f32 to vector<8x64xf32>
    %94 = arith.subf %93, %78 : vector<8x64xf32>
    %95 = arith.mulf %94, %92 : vector<8x64xf32>
    %96 = arith.mulf %78, %68 : vector<8x64xf32>
    %97 = arith.addf %95, %96 : vector<8x64xf32>
    %98 = vector.extract_strided_slice %5 {offsets = [24, 0], sizes = [8, 192], strides = [1, 1]} : vector<64x192xf32> to vector<8x192xf32>
    %cst_22 = arith.constant dense<0.000000e+00> : vector<8x192xf32>
    %99 = tpu.matmul %97, %6, %cst_22 {dimension_numbers = #tpu.dot_dimension_numbers<[1], [0], [0], [1], [0, 0, 1, 1], [], []>} : vector<8x64xf32>, vector<64x192xf32>, vector<8x192xf32> -> vector<8x192xf32>
    %100 = vector.extract_strided_slice %98 {offsets = [0, 0], sizes = [8, 64], strides = [1, 1]} : vector<8x192xf32> to vector<8x64xf32>
    %101 = vector.extract_strided_slice %99 {offsets = [0, 0], sizes = [8, 64], strides = [1, 1]} : vector<8x192xf32> to vector<8x64xf32>
    %102 = arith.addf %100, %101 : vector<8x64xf32>
    %103 = arith.negf %102 : vector<8x64xf32>
    %104 = math.exp %103 : vector<8x64xf32>
    %cst_23 = arith.constant 1.000000e+00 : f32
    %105 = vector.broadcast %cst_23 : f32 to vector<8x64xf32>
    %106 = arith.addf %105, %104 : vector<8x64xf32>
    %107 = arith.divf %105, %106 : vector<8x64xf32>
    %108 = vector.extract_strided_slice %98 {offsets = [0, 64], sizes = [8, 64], strides = [1, 1]} : vector<8x192xf32> to vector<8x64xf32>
    %109 = vector.extract_strided_slice %99 {offsets = [0, 64], sizes = [8, 64], strides = [1, 1]} : vector<8x192xf32> to vector<8x64xf32>
    %110 = arith.addf %108, %109 : vector<8x64xf32>
    %111 = arith.negf %110 : vector<8x64xf32>
    %112 = math.exp %111 : vector<8x64xf32>
    %cst_24 = arith.constant 1.000000e+00 : f32
    %113 = vector.broadcast %cst_24 : f32 to vector<8x64xf32>
    %114 = arith.addf %113, %112 : vector<8x64xf32>
    %115 = arith.divf %113, %114 : vector<8x64xf32>
    %116 = vector.extract_strided_slice %98 {offsets = [0, 128], sizes = [8, 64], strides = [1, 1]} : vector<8x192xf32> to vector<8x64xf32>
    %117 = vector.extract_strided_slice %99 {offsets = [0, 128], sizes = [8, 64], strides = [1, 1]} : vector<8x192xf32> to vector<8x64xf32>
    %118 = arith.addf %117, %9 : vector<8x64xf32>
    %119 = arith.mulf %115, %118 : vector<8x64xf32>
    %120 = arith.addf %116, %119 : vector<8x64xf32>
    %121 = math.tanh %120 : vector<8x64xf32>
    %cst_25 = arith.constant 1.000000e+00 : f32
    %122 = vector.broadcast %cst_25 : f32 to vector<8x64xf32>
    %123 = arith.subf %122, %107 : vector<8x64xf32>
    %124 = arith.mulf %123, %121 : vector<8x64xf32>
    %125 = arith.mulf %107, %97 : vector<8x64xf32>
    %126 = arith.addf %124, %125 : vector<8x64xf32>
    %127 = vector.extract_strided_slice %5 {offsets = [32, 0], sizes = [8, 192], strides = [1, 1]} : vector<64x192xf32> to vector<8x192xf32>
    %cst_26 = arith.constant dense<0.000000e+00> : vector<8x192xf32>
    %128 = tpu.matmul %126, %6, %cst_26 {dimension_numbers = #tpu.dot_dimension_numbers<[1], [0], [0], [1], [0, 0, 1, 1], [], []>} : vector<8x64xf32>, vector<64x192xf32>, vector<8x192xf32> -> vector<8x192xf32>
    %129 = vector.extract_strided_slice %127 {offsets = [0, 0], sizes = [8, 64], strides = [1, 1]} : vector<8x192xf32> to vector<8x64xf32>
    %130 = vector.extract_strided_slice %128 {offsets = [0, 0], sizes = [8, 64], strides = [1, 1]} : vector<8x192xf32> to vector<8x64xf32>
    %131 = arith.addf %129, %130 : vector<8x64xf32>
    %132 = arith.negf %131 : vector<8x64xf32>
    %133 = math.exp %132 : vector<8x64xf32>
    %cst_27 = arith.constant 1.000000e+00 : f32
    %134 = vector.broadcast %cst_27 : f32 to vector<8x64xf32>
    %135 = arith.addf %134, %133 : vector<8x64xf32>
    %136 = arith.divf %134, %135 : vector<8x64xf32>
    %137 = vector.extract_strided_slice %127 {offsets = [0, 64], sizes = [8, 64], strides = [1, 1]} : vector<8x192xf32> to vector<8x64xf32>
    %138 = vector.extract_strided_slice %128 {offsets = [0, 64], sizes = [8, 64], strides = [1, 1]} : vector<8x192xf32> to vector<8x64xf32>
    %139 = arith.addf %137, %138 : vector<8x64xf32>
    %140 = arith.negf %139 : vector<8x64xf32>
    %141 = math.exp %140 : vector<8x64xf32>
    %cst_28 = arith.constant 1.000000e+00 : f32
    %142 = vector.broadcast %cst_28 : f32 to vector<8x64xf32>
    %143 = arith.addf %142, %141 : vector<8x64xf32>
    %144 = arith.divf %142, %143 : vector<8x64xf32>
    %145 = vector.extract_strided_slice %127 {offsets = [0, 128], sizes = [8, 64], strides = [1, 1]} : vector<8x192xf32> to vector<8x64xf32>
    %146 = vector.extract_strided_slice %128 {offsets = [0, 128], sizes = [8, 64], strides = [1, 1]} : vector<8x192xf32> to vector<8x64xf32>
    %147 = arith.addf %146, %9 : vector<8x64xf32>
    %148 = arith.mulf %144, %147 : vector<8x64xf32>
    %149 = arith.addf %145, %148 : vector<8x64xf32>
    %150 = math.tanh %149 : vector<8x64xf32>
    %cst_29 = arith.constant 1.000000e+00 : f32
    %151 = vector.broadcast %cst_29 : f32 to vector<8x64xf32>
    %152 = arith.subf %151, %136 : vector<8x64xf32>
    %153 = arith.mulf %152, %150 : vector<8x64xf32>
    %154 = arith.mulf %136, %126 : vector<8x64xf32>
    %155 = arith.addf %153, %154 : vector<8x64xf32>
    %156 = vector.extract_strided_slice %5 {offsets = [40, 0], sizes = [8, 192], strides = [1, 1]} : vector<64x192xf32> to vector<8x192xf32>
    %cst_30 = arith.constant dense<0.000000e+00> : vector<8x192xf32>
    %157 = tpu.matmul %155, %6, %cst_30 {dimension_numbers = #tpu.dot_dimension_numbers<[1], [0], [0], [1], [0, 0, 1, 1], [], []>} : vector<8x64xf32>, vector<64x192xf32>, vector<8x192xf32> -> vector<8x192xf32>
    %158 = vector.extract_strided_slice %156 {offsets = [0, 0], sizes = [8, 64], strides = [1, 1]} : vector<8x192xf32> to vector<8x64xf32>
    %159 = vector.extract_strided_slice %157 {offsets = [0, 0], sizes = [8, 64], strides = [1, 1]} : vector<8x192xf32> to vector<8x64xf32>
    %160 = arith.addf %158, %159 : vector<8x64xf32>
    %161 = arith.negf %160 : vector<8x64xf32>
    %162 = math.exp %161 : vector<8x64xf32>
    %cst_31 = arith.constant 1.000000e+00 : f32
    %163 = vector.broadcast %cst_31 : f32 to vector<8x64xf32>
    %164 = arith.addf %163, %162 : vector<8x64xf32>
    %165 = arith.divf %163, %164 : vector<8x64xf32>
    %166 = vector.extract_strided_slice %156 {offsets = [0, 64], sizes = [8, 64], strides = [1, 1]} : vector<8x192xf32> to vector<8x64xf32>
    %167 = vector.extract_strided_slice %157 {offsets = [0, 64], sizes = [8, 64], strides = [1, 1]} : vector<8x192xf32> to vector<8x64xf32>
    %168 = arith.addf %166, %167 : vector<8x64xf32>
    %169 = arith.negf %168 : vector<8x64xf32>
    %170 = math.exp %169 : vector<8x64xf32>
    %cst_32 = arith.constant 1.000000e+00 : f32
    %171 = vector.broadcast %cst_32 : f32 to vector<8x64xf32>
    %172 = arith.addf %171, %170 : vector<8x64xf32>
    %173 = arith.divf %171, %172 : vector<8x64xf32>
    %174 = vector.extract_strided_slice %156 {offsets = [0, 128], sizes = [8, 64], strides = [1, 1]} : vector<8x192xf32> to vector<8x64xf32>
    %175 = vector.extract_strided_slice %157 {offsets = [0, 128], sizes = [8, 64], strides = [1, 1]} : vector<8x192xf32> to vector<8x64xf32>
    %176 = arith.addf %175, %9 : vector<8x64xf32>
    %177 = arith.mulf %173, %176 : vector<8x64xf32>
    %178 = arith.addf %174, %177 : vector<8x64xf32>
    %179 = math.tanh %178 : vector<8x64xf32>
    %cst_33 = arith.constant 1.000000e+00 : f32
    %180 = vector.broadcast %cst_33 : f32 to vector<8x64xf32>
    %181 = arith.subf %180, %165 : vector<8x64xf32>
    %182 = arith.mulf %181, %179 : vector<8x64xf32>
    %183 = arith.mulf %165, %155 : vector<8x64xf32>
    %184 = arith.addf %182, %183 : vector<8x64xf32>
    %185 = vector.extract_strided_slice %5 {offsets = [48, 0], sizes = [8, 192], strides = [1, 1]} : vector<64x192xf32> to vector<8x192xf32>
    %cst_34 = arith.constant dense<0.000000e+00> : vector<8x192xf32>
    %186 = tpu.matmul %184, %6, %cst_34 {dimension_numbers = #tpu.dot_dimension_numbers<[1], [0], [0], [1], [0, 0, 1, 1], [], []>} : vector<8x64xf32>, vector<64x192xf32>, vector<8x192xf32> -> vector<8x192xf32>
    %187 = vector.extract_strided_slice %185 {offsets = [0, 0], sizes = [8, 64], strides = [1, 1]} : vector<8x192xf32> to vector<8x64xf32>
    %188 = vector.extract_strided_slice %186 {offsets = [0, 0], sizes = [8, 64], strides = [1, 1]} : vector<8x192xf32> to vector<8x64xf32>
    %189 = arith.addf %187, %188 : vector<8x64xf32>
    %190 = arith.negf %189 : vector<8x64xf32>
    %191 = math.exp %190 : vector<8x64xf32>
    %cst_35 = arith.constant 1.000000e+00 : f32
    %192 = vector.broadcast %cst_35 : f32 to vector<8x64xf32>
    %193 = arith.addf %192, %191 : vector<8x64xf32>
    %194 = arith.divf %192, %193 : vector<8x64xf32>
    %195 = vector.extract_strided_slice %185 {offsets = [0, 64], sizes = [8, 64], strides = [1, 1]} : vector<8x192xf32> to vector<8x64xf32>
    %196 = vector.extract_strided_slice %186 {offsets = [0, 64], sizes = [8, 64], strides = [1, 1]} : vector<8x192xf32> to vector<8x64xf32>
    %197 = arith.addf %195, %196 : vector<8x64xf32>
    %198 = arith.negf %197 : vector<8x64xf32>
    %199 = math.exp %198 : vector<8x64xf32>
    %cst_36 = arith.constant 1.000000e+00 : f32
    %200 = vector.broadcast %cst_36 : f32 to vector<8x64xf32>
    %201 = arith.addf %200, %199 : vector<8x64xf32>
    %202 = arith.divf %200, %201 : vector<8x64xf32>
    %203 = vector.extract_strided_slice %185 {offsets = [0, 128], sizes = [8, 64], strides = [1, 1]} : vector<8x192xf32> to vector<8x64xf32>
    %204 = vector.extract_strided_slice %186 {offsets = [0, 128], sizes = [8, 64], strides = [1, 1]} : vector<8x192xf32> to vector<8x64xf32>
    %205 = arith.addf %204, %9 : vector<8x64xf32>
    %206 = arith.mulf %202, %205 : vector<8x64xf32>
    %207 = arith.addf %203, %206 : vector<8x64xf32>
    %208 = math.tanh %207 : vector<8x64xf32>
    %cst_37 = arith.constant 1.000000e+00 : f32
    %209 = vector.broadcast %cst_37 : f32 to vector<8x64xf32>
    %210 = arith.subf %209, %194 : vector<8x64xf32>
    %211 = arith.mulf %210, %208 : vector<8x64xf32>
    %212 = arith.mulf %194, %184 : vector<8x64xf32>
    %213 = arith.addf %211, %212 : vector<8x64xf32>
    %214 = vector.extract_strided_slice %5 {offsets = [56, 0], sizes = [8, 192], strides = [1, 1]} : vector<64x192xf32> to vector<8x192xf32>
    %cst_38 = arith.constant dense<0.000000e+00> : vector<8x192xf32>
    %215 = tpu.matmul %213, %6, %cst_38 {dimension_numbers = #tpu.dot_dimension_numbers<[1], [0], [0], [1], [0, 0, 1, 1], [], []>} : vector<8x64xf32>, vector<64x192xf32>, vector<8x192xf32> -> vector<8x192xf32>
    %216 = vector.extract_strided_slice %214 {offsets = [0, 0], sizes = [8, 64], strides = [1, 1]} : vector<8x192xf32> to vector<8x64xf32>
    %217 = vector.extract_strided_slice %215 {offsets = [0, 0], sizes = [8, 64], strides = [1, 1]} : vector<8x192xf32> to vector<8x64xf32>
    %218 = arith.addf %216, %217 : vector<8x64xf32>
    %219 = arith.negf %218 : vector<8x64xf32>
    %220 = math.exp %219 : vector<8x64xf32>
    %cst_39 = arith.constant 1.000000e+00 : f32
    %221 = vector.broadcast %cst_39 : f32 to vector<8x64xf32>
    %222 = arith.addf %221, %220 : vector<8x64xf32>
    %223 = arith.divf %221, %222 : vector<8x64xf32>
    %224 = vector.extract_strided_slice %214 {offsets = [0, 64], sizes = [8, 64], strides = [1, 1]} : vector<8x192xf32> to vector<8x64xf32>
    %225 = vector.extract_strided_slice %215 {offsets = [0, 64], sizes = [8, 64], strides = [1, 1]} : vector<8x192xf32> to vector<8x64xf32>
    %226 = arith.addf %224, %225 : vector<8x64xf32>
    %227 = arith.negf %226 : vector<8x64xf32>
    %228 = math.exp %227 : vector<8x64xf32>
    %cst_40 = arith.constant 1.000000e+00 : f32
    %229 = vector.broadcast %cst_40 : f32 to vector<8x64xf32>
    %230 = arith.addf %229, %228 : vector<8x64xf32>
    %231 = arith.divf %229, %230 : vector<8x64xf32>
    %232 = vector.extract_strided_slice %214 {offsets = [0, 128], sizes = [8, 64], strides = [1, 1]} : vector<8x192xf32> to vector<8x64xf32>
    %233 = vector.extract_strided_slice %215 {offsets = [0, 128], sizes = [8, 64], strides = [1, 1]} : vector<8x192xf32> to vector<8x64xf32>
    %234 = arith.addf %233, %9 : vector<8x64xf32>
    %235 = arith.mulf %231, %234 : vector<8x64xf32>
    %236 = arith.addf %232, %235 : vector<8x64xf32>
    %237 = math.tanh %236 : vector<8x64xf32>
    %cst_41 = arith.constant 1.000000e+00 : f32
    %238 = vector.broadcast %cst_41 : f32 to vector<8x64xf32>
    %239 = arith.subf %238, %223 : vector<8x64xf32>
    %240 = arith.mulf %239, %237 : vector<8x64xf32>
    %241 = arith.mulf %223, %213 : vector<8x64xf32>
    %242 = arith.addf %240, %241 : vector<8x64xf32>
    %c0_42 = arith.constant 0 : index
    %c0_43 = arith.constant 0 : index
    %243 = vector.load %arg5[%c0_42, %c0_43] : memref<64x8xf32, #tpu.memory_space<vmem>>, vector<64x8xf32>
    %cst_44 = arith.constant dense<0.000000e+00> : vector<8x8xf32>
    %244 = tpu.matmul %242, %243, %cst_44 {dimension_numbers = #tpu.dot_dimension_numbers<[1], [0], [0], [1], [0, 0, 1, 1], [], []>} : vector<8x64xf32>, vector<64x8xf32>, vector<8x8xf32> -> vector<8x8xf32>
    %c0_45 = arith.constant 0 : index
    %c0_46 = arith.constant 0 : index
    %245 = vector.load %arg6[%c0_45, %c0_46] : memref<1x8xf32, #tpu.memory_space<vmem>>, vector<1x8xf32>
    %246 = vector.broadcast %245 : vector<1x8xf32> to vector<8x8xf32>
    %247 = arith.addf %244, %246 : vector<8x8xf32>
    %cst_47 = arith.constant dense<0xFF800000> : vector<8xf32>
    %248 = vector.multi_reduction <maximumf>, %247, %cst_47 [1] : vector<8x8xf32> to vector<8xf32>
    %249 = vector.shape_cast %248 : vector<8xf32> to vector<8x1xf32>
    %250 = vector.broadcast %249 : vector<8x1xf32> to vector<8x8xf32>
    %251 = arith.subf %247, %250 : vector<8x8xf32>
    %252 = math.exp %251 : vector<8x8xf32>
    %cst_48 = arith.constant dense<0.000000e+00> : vector<8xf32>
    %253 = vector.multi_reduction <add>, %252, %cst_48 [1] : vector<8x8xf32> to vector<8xf32>
    %254 = vector.shape_cast %253 : vector<8xf32> to vector<8x1xf32>
    %255 = vector.broadcast %254 : vector<8x1xf32> to vector<8x8xf32>
    %256 = arith.divf %252, %255 : vector<8x8xf32>
    %c0_49 = arith.constant 0 : index
    %c0_50 = arith.constant 0 : index
    %257 = vector.load %arg7[%c0_49, %c0_50] : memref<8x8xf32, #tpu.memory_space<vmem>>, vector<8x8xf32>
    tpu.vector_store %arg7[%c0_49, %c0_50], %256 {strides = array<i32>} : memref<8x8xf32, #tpu.memory_space<vmem>>, vector<8x8xf32>,
    return
  }
}

</mosaic_0001>

<bundles_post_ra>
// kernel: gru_forward.2
= control target key start
LH: loop header
LB: loop body
LE: loop exit
PB: predicated region body
PF: predicated region fallthrough
CT: control target
= control target key end

     0   :  { %s1625_s0 = inlined_call_operand.vmem [shape: f32[48,192], index: 0, kind: input, shape index: {}]   ;;  %s1626_s1 = inlined_call_operand.hbm [shape: f32[64,192], index: 1, kind: input, shape index: {}]   ;;  %s1627_s2 = inlined_call_operand.vmem [shape: f32[1,192], index: 2, kind: input, shape index: {}]   ;;  %s1628_s3 = inlined_call_operand.vmem [shape: f32[1,64], index: 3, kind: input, shape index: {}]   ;;  %s1629_s4 = inlined_call_operand.vmem [shape: f32[64,8], index: 4, kind: input, shape index: {}]   ;;  %s1630_s5 = inlined_call_operand.vmem [shape: f32[1,8], index: 5, kind: input, shape index: {}]   ;;  %s1631_s6 = inlined_call_operand.vmem [shape: f32[8,2,46], index: 6, kind: input, shape index: {}]   ;;  %s1632_s7 = inlined_call_operand.<no memory space> [shape: f32[], index: 7, kind: input, shape index: {}]   ;;  %s1633_s8 = inlined_call_operand.vmem [shape: f32[8,8], index: 8, kind: output, shape index: {}]  }
   0x1   :  { %v1206_v0 = vstv %s1632_s7 }
   0x2   :  { %14 = vsyncpa [#allocation8], 0  ;;  %s23_s9 = sshll.u32 %s1626_s1, 4  ;;  %s1153_s10 = smov [#allocation7]   ;;  %s24_s9 = int_to_ptr.hbm [resolvable:$true] %s23_s9 }
   0x3   :  { %s25_s11 = sshll.u32 %s1153_s10, 4  ;;  %s1154_s12 = smov 256   ;;  %s26_s11 = int_to_ptr.vmem [resolvable:$true] %s25_s11 }
   0x4   :  { %s1155_s13 = smov 16  }
   0x5   :  { %31 = dma.hbm_to_vmem [thread:$0]  %s24_s9, 2048, %s26_s11, [#allocation8], %s1154_s12, %s1154_s12, %s1155_s13  }
   0x6   :  { %1151 = dma.done.wait [#allocation8], 2048  }
   0x7   :  { %1152 = vsyncadd [#allocation8], 4294965248  ;;  %v1211_v1 = vld [vmem:[#allocation7 + $0x78] sm:$0xff]  ;;  %v1213_v2 = vld [vmem:[#allocation7 + $0x68] sm:$0xff]  ;;  %v45_v3 = vlaneseq  ;;  %vm196_vm2 = vcmask 392192   ;;  %v1156_v29 = vmov 0.0  }
   0x8   :  { %355 = vmatpush.msra.mxu3 %v1211_v1  ;;  %v1216_v4 = vld [vmem:[#allocation7 + $0x58] sm:$0xff]  ;;  %v1218_v5 = vld [vmem:[#allocation7 + $0x70] sm:$0xff]  ;;  %v1222_v6 = vld [vmem:[#allocation7 + $0x60] sm:$0xff]  ;;  %vm323_vm7 = vcmask 523264  }
   0x9   :  { %335 = vmatpush.msra.mxu2 %v1218_v5  ;;  %v1224_v7 = vld [vmem:[#allocation7 + $0x48] sm:$0xff]  ;;  %v1226_v8 = vld [vmem:[#allocation7 + $0x50] sm:$0xff]  ;;  %v1231_v10 = vshrl.u32 %v45_v3, 7  ;;  %v186_v11 = vld [vmem:[%s1625_s0 + $0x40] sm:$0xff]  ;;  %v1249_v16 = vand.u32 127, %v45_v3 }
   0xa   :  { %356 = vmatpush.msra.mxu3 %v1213_v2  ;;  %v188_v9 = vld [vmem:[%s1625_s0 + $0x50] sm:$0xff]  ;;  %v1238_v12 = vld [vmem:[#allocation7 + $0x38] sm:$0xff]  ;;  %v1240_v13 = vld [vmem:[#allocation7 + $0x40] sm:$0xff] }
   0xb   :  { %336 = vmatpush.msra.mxu2 %v1222_v6  ;;  %231 = vmatpush.msra.mxu0 %v188_v9  ;;  %v1243_v14 = vld [vmem:[#allocation7 + $0x28] sm:$0xff]  ;;  %v184_v15 = vld [vmem:[%s1625_s0 + $0x30] sm:$0xff]  ;;  %v44_v18 = vld [vmem:[%s1631_s6] sm:$0x3]  ;;  %vm48_vm0 = vcmp.lt.s32.totalorder %v1231_v10, 2  ;;  %vm53_vm1 = vcmp.lt.s32.totalorder %v1249_v16, 46 }
   0xc   :  { %357 = vmatpush.msra.mxu3 %v1216_v4  ;;  %v1251_v17 = vld [vmem:[#allocation7 + $0x30] sm:$0xff]  ;;  %v182_v19 = vld [vmem:[%s1625_s0 + $0x20] sm:$0xff]  ;;  %v1262_v20 = vld [vmem:[#allocation7 + $0x18] sm:$0xff]  ;;  %v49_v23 = vsel %vm48_vm0, %v44_v18, %v1206_v0 }
   0xd   :  { %337 = vmatpush.msra.mxu2 %v1226_v8  ;;  %232 = vmatpush.msra.mxu0 %v186_v11  ;;  %v1264_v21 = vld [vmem:[#allocation7 + $0x20] sm:$0xff]  ;;  %v180_v22 = vld [vmem:[%s1625_s0 + $0x10] sm:$0xff]  ;;  %v1275_v24 = vld [vmem:[#allocation7 + $0x8] sm:$0xff]  ;;  %v1289_v28 = vsel %vm53_vm1, %v49_v23, %v1206_v0 }
   0xe   :  { %358 = vmatpush.msra.mxu3 %v1224_v7  ;;  %v1277_v25 = vld [vmem:[#allocation7 + $0x10] sm:$0xff]  ;;  %v178_v26 = vld [vmem:[%s1625_s0] sm:$0xff]  ;;  %v189_v30 = vld [vmem:[%s1625_s0 + $0x58] sm:$0xff] }
   0xf   :  { %338 = vmatpush.msra.mxu2 %v1240_v13  ;;  %233 = vmatpush.msra.mxu0 %v184_v15  ;;  %v1284_v27 = vld [vmem:[#allocation7] sm:$0xff]  ;;  %v187_v31 = vld [vmem:[%s1625_s0 + $0x48] sm:$0xff]  ;;  %v185_v32 = vld [vmem:[%s1625_s0 + $0x38] sm:$0xff] }
  0x10   :  { %359 = vmatpush.msra.mxu3 %v1238_v12  ;;  %272 = vmatpush.msra.mxu1 %v189_v30  ;;  %v183_v33 = vld [vmem:[%s1625_s0 + $0x28] sm:$0xff]  ;;  %v181_v34 = vld [vmem:[%s1625_s0 + $0x18] sm:$0xff]  ;;  %v1367_v36 = vld [vmem:[%s1628_s3] ss:$0 sm:$0xff] }
  0x11   :  { %339 = vmatpush.msra.mxu2 %v1251_v17  ;;  %234 = vmatpush.msra.mxu0 %v182_v19  ;;  %v179_v35 = vld [vmem:[%s1625_s0 + $0x8] sm:$0xff]  ;;  %s1157_s0 = smov 64   ;;  %v190_v39 = vld [vmem:[%s1627_s2] sm:$0x3]  ;;  %v1022_v60 = vld [vmem:[%s1631_s6 + $0x2] sm:$0x3] }
  0x12   :  { %360 = vmatpush.msra.mxu3 %v1243_v14  ;;  %273 = vmatpush.msra.mxu1 %v187_v31  ;;  %v1390_v40 = vperm.slane %v190_v39, 0  ;;  %v64_v61 = vsel %vm48_vm0, %v1022_v60, %v1206_v0  ;;  %v1405_v63 = vperm.slane %v190_v39, 1 }
  0x13   :  { %340 = vmatpush.msra.mxu2 %v1264_v21  ;;  %235 = vmatpush.msra.mxu0 %v180_v22  ;;  %v69_v62 = vsel %vm53_vm1, %v64_v61, %v1206_v0 }
  0x14   :  { %361 = vmatpush.msra.mxu3 %v1262_v20  ;;  %274 = vmatpush.msra.mxu1 %v185_v32 }
  0x15   :  { %341 = vmatpush.msra.mxu2 %v1277_v25  ;;  %236 = vmatpush.msra.mxu0 %v178_v26 }
  0x16   :  { %362 = vmatpush.msra.mxu3 %v1275_v24  ;;  %1029 = vmatmul.msk.f32.vlgmr.msra.gmra.mxu0 %vm196_vm2, %v1289_v28 }
  0x17   :  { %363 = vmatmul.f32.vlgmr.msra.gmra.mxu3 %v1156_v29  ;;  %342 = vmatpush.msra.mxu2 %v1284_v27 }
  0x18   :  { %343 = vmatmul.f32.vlgmr.msra.gmra.mxu2 %v1156_v29  ;;  %434 = vmatpush.msrb.mxu3 %v1211_v1 }
  0x19   :  { %414 = vmatpush.msrb.mxu2 %v1218_v5  ;;  %651 = vmatpush.msrb.mxu0 %v1218_v5 }
  0x1a   :  { %435 = vmatpush.msrb.mxu3 %v1213_v2  ;;  %275 = vmatpush.msra.mxu1 %v183_v33 }
  0x1b   :  { %415 = vmatpush.msrb.mxu2 %v1222_v6  ;;  %652 = vmatpush.msrb.mxu0 %v1222_v6 }
  0x1c   :  { %436 = vmatpush.msrb.mxu3 %v1216_v4  ;;  %276 = vmatpush.msra.mxu1 %v181_v34 }
  0x1d   :  { %416 = vmatpush.msrb.mxu2 %v1226_v8  ;;  %653 = vmatpush.msrb.mxu0 %v1226_v8 }
  0x1e   :  { %437 = vmatpush.msrb.mxu3 %v1224_v7  ;;  %277 = vmatpush.msra.mxu1 %v179_v35 }
  0x1f   :  { %417 = vmatpush.msrb.mxu2 %v1240_v13  ;;  %654 = vmatpush.msrb.mxu0 %v1240_v13 }
  0x20   :  { %438 = vmatpush.msrb.mxu3 %v1238_v12  ;;  %1037 = vmatmul.msk.f32.vlgmr.msra.gmra.mxu1 %vm196_vm2, %v1289_v28 }
  0x21   :  { %418 = vmatpush.msrb.mxu2 %v1251_v17  ;;  %655 = vmatpush.msrb.mxu0 %v1251_v17 }
  0x22   :  { %439 = vmatpush.msrb.mxu3 %v1243_v14  ;;  %671 = vmatpush.msrb.mxu1 %v1211_v1 }
  0x23   :  { %419 = vmatpush.msrb.mxu2 %v1264_v21  ;;  %656 = vmatpush.msrb.mxu0 %v1264_v21 }
  0x24   :  { %440 = vmatpush.msrb.mxu3 %v1262_v20  ;;  %672 = vmatpush.msrb.mxu1 %v1213_v2 }
  0x25   :  { %420 = vmatpush.msrb.mxu2 %v1277_v25  ;;  %657 = vmatpush.msrb.mxu0 %v1277_v25 }
  0x26   :  { %441 = vmatpush.msrb.mxu3 %v1275_v24  ;;  %673 = vmatpush.msrb.mxu1 %v1216_v4 }
  0x27   :  { %421 = vmatpush.msrb.mxu2 %v1284_v27  ;;  %658 = vmatpush.msrb.mxu0 %v1284_v27 }
  0x28   :  { %513 = vmatpush.msra.mxu3 %v1211_v1  ;;  %674 = vmatpush.msrb.mxu1 %v1224_v7 }
  0x29   :  { %493 = vmatpush.msra.mxu2 %v1218_v5  ;;  %809 = vmatpush.msra.mxu0 %v1218_v5 }
  0x2a   :  { %514 = vmatpush.msra.mxu3 %v1213_v2  ;;  %675 = vmatpush.msrb.mxu1 %v1238_v12 }
  0x2b   :  { %494 = vmatpush.msra.mxu2 %v1222_v6  ;;  %810 = vmatpush.msra.mxu0 %v1222_v6 }
  0x2c   :  { %515 = vmatpush.msra.mxu3 %v1216_v4  ;;  %676 = vmatpush.msrb.mxu1 %v1243_v14 }
  0x2d   :  { %495 = vmatpush.msra.mxu2 %v1226_v8  ;;  %811 = vmatpush.msra.mxu0 %v1226_v8 }
  0x2e   :  { %516 = vmatpush.msra.mxu3 %v1224_v7  ;;  %677 = vmatpush.msrb.mxu1 %v1262_v20 }
  0x2f   :  { %496 = vmatpush.msra.mxu2 %v1240_v13  ;;  %812 = vmatpush.msra.mxu0 %v1240_v13 }
  0x30   :  { %517 = vmatpush.msra.mxu3 %v1238_v12  ;;  %678 = vmatpush.msrb.mxu1 %v1275_v24 }
  0x31   :  { %497 = vmatpush.msra.mxu2 %v1251_v17  ;;  %813 = vmatpush.msra.mxu0 %v1251_v17 }
  0x32   :  { %518 = vmatpush.msra.mxu3 %v1243_v14  ;;  %829 = vmatpush.msra.mxu1 %v1211_v1 }
  0x33   :  { %498 = vmatpush.msra.mxu2 %v1264_v21  ;;  %814 = vmatpush.msra.mxu0 %v1264_v21 }
  0x34   :  { %519 = vmatpush.msra.mxu3 %v1262_v20  ;;  %830 = vmatpush.msra.mxu1 %v1213_v2 }
  0x35   :  { %499 = vmatpush.msra.mxu2 %v1277_v25  ;;  %815 = vmatpush.msra.mxu0 %v1277_v25 }
  0x36   :  { %520 = vmatpush.msra.mxu3 %v1275_v24  ;;  %831 = vmatpush.msra.mxu1 %v1216_v4 }
  0x37   :  { %500 = vmatpush.msra.mxu2 %v1284_v27  ;;  %816 = vmatpush.msra.mxu0 %v1284_v27 }
  0x38   :  { %832 = vmatpush.msra.mxu1 %v1224_v7  ;;  %1030 = vmatmul.msk.f32.gmra.mxu0 %vm196_vm2, %v69_v62 }
  0x39   :  { %1038 = vmatmul.msk.f32.gmra.mxu1 %vm196_vm2, %v69_v62 }
  0x3a   :  { %833 = vmatpush.msra.mxu1 %v1238_v12 }
  0x3c   :  { %834 = vmatpush.msra.mxu1 %v1243_v14 }
  0x3e   :  { %835 = vmatpush.msra.mxu1 %v1262_v20 }
  0x40   :  { %836 = vmatpush.msra.mxu1 %v1275_v24 }
  0x93   :  { %v238_v41 = vpop.f32.mrf.mxu0 }
  0x94   :  { %v239_v42 = vadd.f32 %v238_v41, %v1390_v40 }
  0x9a   :  { %v364_v37 = vpop.f32.mrf.mxu3 }
  0x9b   :  { %v387_v38 = vadd.f32 %v1367_v36, %v364_v37  ;;  %v344_v43 = vpop.f32.mrf.mxu2 }
  0x9c   :  { %v367_v44 = vadd.f32 %v344_v43, %v239_v42 }
  0x9d   :  { %389 = vrot.lane.b32.xlu0 %v387_v38, %s1157_s0  ;;  %v279_v3 = vpop.f32.mrf.mxu1 }
  0x9e   :  { %v1045_v45 = vmul.f32 -1.442695, %v367_v44  ;;  %v280_v9 = vadd.f32 %v279_v3, %v1405_v63 }
  0xa0   :  { %1075 = vpow2.f32 %v1045_v45 }
  0xa6   :  { %v1076_v46 = vpop.eup %1075 }
  0xa7   :  { %v371_v47 = vadd.f32 1.0, %v1076_v46 }
  0xa9   :  { %1077 = vrcp.f32 %v371_v47  ;;  %vm377_vm3 = vweird.f32 %v371_v47  ;;  %v383_v52 = vand.u32 2147483648, %v371_v47  ;;  %v381_v54 = vand.u32 2147483647, %v371_v47 }
  0xab   :  { %v384_v55 = vor.u32 1.1754944e-38, %v383_v52  ;;  %vm382_vm6 = vcmp.eq.f32.partialorder %v381_v54, 8.507059e+37 }
  0xaf   :  { %v1078_v48 = vpop.eup %1077 }
  0xb0   :  { %v373_v49 = vmul.f32 %v1078_v48, %v371_v47  ;;  %vm378_vm4 = vweird.f32 %v1078_v48 }
  0xb1   :  { %vm379_vm5 = vmor %vm377_vm3, %vm378_vm4 }
  0xb2   :  { %v374_v50 = vsub.f32 1.0, %v373_v49 }
  0xb4   :  { %v375_v51 = vmul.f32 %v1078_v48, %v374_v50 }
  0xb5   :  { %v241_v30 = vpop.f32.mrf.mxu0 }
  0xb6   :  { %v376_v53 = vadd.f32 %v1078_v48, %v375_v51  ;;  %v242_v31 = vadd.f32 %v241_v30, %v1390_v40  ;;  %v1023_v51 = vld [vmem:[%s1631_s6 + $0x4] sm:$0x3]  ;;  %v282_v54 = vpop.f32.mrf.mxu1 }
  0xb7   :  { %v80_v52 = vsel %vm48_vm0, %v1023_v51, %v1206_v0 }
  0xb8   :  { %v380_v56 = vsel %vm379_vm5, %v1078_v48, %v376_v53  ;;  %v85_v53 = vsel %vm53_vm1, %v80_v52, %v1206_v0 }
  0xb9   :  { %v385_v58 = vsel %vm382_vm6, %v384_v55, %v380_v56  ;;  %1031 = vmatmul.msk.f32.gmra.mxu0 %vm196_vm2, %v85_v53  ;;  %1039 = vmatmul.msk.f32.gmra.mxu1 %vm196_vm2, %v85_v53  ;;  %v283_v55 = vadd.f32 %v282_v54, %v1405_v63 }
  0xba   :  { %v399_v18 = vsub.f32 1.0, %v385_v58  ;;  %v401_v22 = vmul.f32 0.0, %v385_v58 }
 0x10f   :  { %v390_v57 = vpop.permute.xlu0 %389 }
 0x110   :  { %v392_v59 = vmul.f32 %v390_v57, %v385_v58 }
 0x112   :  { %394 = vrot.lane.b32.xlu0 %v392_v59, %s1157_s0 }
 0x184   :  { %v395_v11 = vpop.permute.xlu0 %394 }
 0x185   :  { %v397_v15 = vadd.f32 %v395_v11, %v280_v9  ;;  %v244_v11 = vpop.f32.mrf.mxu0 }
 0x187   :  { %1079 = vtanh.f32 %v397_v15  ;;  %v245_v15 = vadd.f32 %v244_v11, %v1390_v40 }
 0x18d   :  { %v1080_v19 = vpop.eup %1079 }
 0x18e   :  { %v400_v23 = vmul.f32 %v1080_v19, %v399_v18 }
 0x190   :  { %v402_v26 = vadd.f32 %v401_v22, %v400_v23 }
 0x192   :  { %1046 = vmatmul.msk.f32.vlgmr.msrb.gmra.mxu2 %vm323_vm7, %v402_v26  ;;  %1047 = vmatmul.msk.f32.vlgmr.msrb.gmra.mxu3 %vm323_vm7, %v402_v26 }
 0x193   :  { %572 = vmatpush.msrb.mxu2 %v1218_v5  ;;  %592 = vmatpush.msrb.mxu3 %v1211_v1 }
 0x195   :  { %573 = vmatpush.msrb.mxu2 %v1222_v6  ;;  %593 = vmatpush.msrb.mxu3 %v1213_v2 }
 0x197   :  { %574 = vmatpush.msrb.mxu2 %v1226_v8  ;;  %594 = vmatpush.msrb.mxu3 %v1216_v4 }
 0x199   :  { %575 = vmatpush.msrb.mxu2 %v1240_v13  ;;  %595 = vmatpush.msrb.mxu3 %v1224_v7 }
 0x19b   :  { %576 = vmatpush.msrb.mxu2 %v1251_v17  ;;  %596 = vmatpush.msrb.mxu3 %v1238_v12 }
 0x19d   :  { %577 = vmatpush.msrb.mxu2 %v1264_v21  ;;  %597 = vmatpush.msrb.mxu3 %v1243_v14 }
 0x19f   :  { %578 = vmatpush.msrb.mxu2 %v1277_v25  ;;  %598 = vmatpush.msrb.mxu3 %v1262_v20 }
 0x1a1   :  { %579 = vmatpush.msrb.mxu2 %v1284_v27  ;;  %599 = vmatpush.msrb.mxu3 %v1275_v24 }
 0x215   :  { %v443_v28 = vpop.f32.mrf.mxu3  ;;  %v423_v32 = vpop.f32.mrf.mxu2 }
 0x216   :  { %v466_v29 = vadd.f32 %v1367_v36, %v443_v28  ;;  %v446_v33 = vadd.f32 %v423_v32, %v242_v31 }
 0x218   :  { %468 = vrot.lane.b32.xlu1 %v466_v29, %s1157_s0  ;;  %v1048_v34 = vmul.f32 -1.442695, %v446_v33 }
 0x21a   :  { %1081 = vpow2.f32 %v1048_v34 }
 0x220   :  { %v1082_v35 = vpop.eup %1081 }
 0x221   :  { %v450_v37 = vadd.f32 1.0, %v1082_v35 }
 0x223   :  { %1083 = vrcp.f32 %v450_v37  ;;  %v462_v44 = vand.u32 2147483648, %v450_v37  ;;  %vm456_vm9 = vweird.f32 %v450_v37  ;;  %v460_v45 = vand.u32 2147483647, %v450_v37 }
 0x225   :  { %v463_v47 = vor.u32 1.1754944e-38, %v462_v44  ;;  %vm461_vm11 = vcmp.eq.f32.partialorder %v460_v45, 8.507059e+37  ;;  %v285_v45 = vpop.f32.mrf.mxu1 }
 0x229   :  { %v1084_v38 = vpop.eup %1083 }
 0x22a   :  { %v452_v39 = vmul.f32 %v1084_v38, %v450_v37  ;;  %vm457_vm8 = vweird.f32 %v1084_v38 }
 0x22b   :  { %vm458_vm10 = vmor %vm456_vm9, %vm457_vm8 }
 0x22c   :  { %v453_v41 = vsub.f32 1.0, %v452_v39 }
 0x22e   :  { %v454_v42 = vmul.f32 %v1084_v38, %v453_v41 }
 0x230   :  { %v455_v43 = vadd.f32 %v1084_v38, %v454_v42  ;;  %v1024_v42 = vld [vmem:[%s1631_s6 + $0x6] sm:$0x3] }
 0x232   :  { %v459_v46 = vsel %vm458_vm10, %v1084_v38, %v455_v43  ;;  %v96_v43 = vsel %vm48_vm0, %v1024_v42, %v1206_v0 }
 0x233   :  { %v464_v49 = vsel %vm461_vm11, %v463_v47, %v459_v46  ;;  %v101_v44 = vsel %vm53_vm1, %v96_v43, %v1206_v0  ;;  %v286_v46 = vadd.f32 %v285_v45, %v1405_v63 }
 0x234   :  { %v478_v58 = vsub.f32 1.0, %v464_v49  ;;  %v480_v60 = vmul.f32 %v464_v49, %v402_v26  ;;  %1032 = vmatmul.msk.f32.gmra.mxu0 %vm196_vm2, %v101_v44  ;;  %1040 = vmatmul.msk.f32.gmra.mxu1 %vm196_vm2, %v101_v44 }
 0x28a   :  { %v469_v48 = vpop.permute.xlu1 %468 }
 0x28b   :  { %v471_v50 = vmul.f32 %v469_v48, %v464_v49 }
 0x28d   :  { %473 = vrot.lane.b32.xlu1 %v471_v50, %s1157_s0 }
 0x2ff   :  { %v474_v56 = vpop.permute.xlu1 %473 }
 0x300   :  { %v476_v57 = vadd.f32 %v474_v56, %v283_v55  ;;  %v1027_v55 = vld [vmem:[%s1631_s6 + $0xc] sm:$0x3] }
 0x301   :  { %v144_v56 = vsel %vm48_vm0, %v1027_v55, %v1206_v0 }
 0x302   :  { %1085 = vtanh.f32 %v476_v57 }
 0x308   :  { %v1086_v59 = vpop.eup %1085 }
 0x309   :  { %v479_v61 = vmul.f32 %v1086_v59, %v478_v58  ;;  %v149_v58 = vsel %vm53_vm1, %v144_v56, %v1206_v0 }
 0x30b   :  { %v481_v62 = vadd.f32 %v480_v60, %v479_v61 }
 0x30d   :  { %1049 = vmatmul.msk.f32.vlgmr.msra.gmra.mxu2 %vm323_vm7, %v481_v62  ;;  %1050 = vmatmul.msk.f32.vlgmr.msra.gmra.mxu3 %vm323_vm7, %v481_v62 }
 0x30e   :  { %730 = vmatpush.msra.mxu2 %v1218_v5  ;;  %750 = vmatpush.msra.mxu3 %v1211_v1 }
 0x310   :  { %731 = vmatpush.msra.mxu2 %v1222_v6  ;;  %751 = vmatpush.msra.mxu3 %v1213_v2 }
 0x312   :  { %732 = vmatpush.msra.mxu2 %v1226_v8  ;;  %752 = vmatpush.msra.mxu3 %v1216_v4 }
 0x314   :  { %733 = vmatpush.msra.mxu2 %v1240_v13  ;;  %753 = vmatpush.msra.mxu3 %v1224_v7 }
 0x316   :  { %734 = vmatpush.msra.mxu2 %v1251_v17  ;;  %754 = vmatpush.msra.mxu3 %v1238_v12 }
 0x318   :  { %735 = vmatpush.msra.mxu2 %v1264_v21  ;;  %755 = vmatpush.msra.mxu3 %v1243_v14 }
 0x31a   :  { %736 = vmatpush.msra.mxu2 %v1277_v25  ;;  %756 = vmatpush.msra.mxu3 %v1262_v20 }
 0x31c   :  { %737 = vmatpush.msra.mxu2 %v1284_v27  ;;  %757 = vmatpush.msra.mxu3 %v1275_v24 }
 0x390   :  { %v522_v3 = vpop.f32.mrf.mxu3  ;;  %v502_v18 = vpop.f32.mrf.mxu2 }
 0x391   :  { %v545_v9 = vadd.f32 %v1367_v36, %v522_v3  ;;  %v525_v19 = vadd.f32 %v502_v18, %v245_v15 }
 0x393   :  { %547 = vrot.lane.b32.xlu2 %v545_v9, %s1157_s0  ;;  %v1051_v22 = vmul.f32 -1.442695, %v525_v19  ;;  %v1028_v19 = vld [vmem:[%s1631_s6 + $0xe] sm:$0x3] }
 0x395   :  { %1087 = vpow2.f32 %v1051_v22  ;;  %v160_v22 = vsel %vm48_vm0, %v1028_v19, %v1206_v0 }
 0x39b   :  { %v1088_v23 = vpop.eup %1087 }
 0x39c   :  { %v529_v26 = vadd.f32 1.0, %v1088_v23  ;;  %v165_v23 = vsel %vm53_vm1, %v160_v22, %v1206_v0 }
 0x39e   :  { %1089 = vrcp.f32 %v529_v26  ;;  %v541_v33 = vand.u32 2147483648, %v529_v26  ;;  %vm535_vm13 = vweird.f32 %v529_v26  ;;  %v539_v34 = vand.u32 2147483647, %v529_v26 }
 0x3a0   :  { %v542_v37 = vor.u32 1.1754944e-38, %v541_v33  ;;  %vm540_vm15 = vcmp.eq.f32.partialorder %v539_v34, 8.507059e+37 }
 0x3a4   :  { %v1090_v28 = vpop.eup %1089 }
 0x3a5   :  { %v531_v29 = vmul.f32 %v1090_v28, %v529_v26  ;;  %vm536_vm12 = vweird.f32 %v1090_v28  ;;  %v288_v26 = vpop.f32.mrf.mxu1 }
 0x3a6   :  { %vm537_vm14 = vmor %vm535_vm13, %vm536_vm12 }
 0x3a7   :  { %v532_v30 = vsub.f32 1.0, %v531_v29 }
 0x3a9   :  { %v533_v31 = vmul.f32 %v1090_v28, %v532_v30 }
 0x3ab   :  { %v534_v32 = vadd.f32 %v1090_v28, %v533_v31 }
 0x3ad   :  { %v538_v35 = vsel %vm537_vm14, %v1090_v28, %v534_v32  ;;  %v289_v28 = vadd.f32 %v288_v26, %v1405_v63 }
 0x3ae   :  { %v543_v39 = vsel %vm540_vm15, %v542_v37, %v538_v35 }
 0x3af   :  { %v557_v49 = vsub.f32 1.0, %v543_v39  ;;  %v559_v51 = vmul.f32 %v543_v39, %v481_v62 }
 0x3ed   :  { %v548_v38 = vpop.permute.xlu2 %547 }
 0x3ee   :  { %v550_v41 = vmul.f32 %v548_v38, %v543_v39 }
 0x3f0   :  { %552 = vrot.lane.b32.xlu2 %v550_v41, %s1157_s0 }
 0x44a   :  { %v553_v47 = vpop.permute.xlu2 %552 }
 0x44b   :  { %v555_v48 = vadd.f32 %v553_v47, %v286_v46 }
 0x44d   :  { %1091 = vtanh.f32 %v555_v48 }
 0x453   :  { %v1092_v50 = vpop.eup %1091 }
 0x454   :  { %v558_v52 = vmul.f32 %v1092_v50, %v557_v49 }
 0x456   :  { %v1476_v53 = vadd.f32 %v559_v51, %v558_v52 }
 0x458   :  { %1052 = vmatmul.msk.f32.vlgmr.msrb.gmra.mxu2 %vm323_vm7, %v1476_v53  ;;  %1053 = vmatmul.msk.f32.vlgmr.msrb.gmra.mxu3 %vm323_vm7, %v1476_v53 }
 0x459   :  { %888 = vmatpush.msrb.mxu2 %v1218_v5  ;;  %908 = vmatpush.msrb.mxu3 %v1211_v1 }
 0x45b   :  { %889 = vmatpush.msrb.mxu2 %v1222_v6  ;;  %909 = vmatpush.msrb.mxu3 %v1213_v2 }
 0x45d   :  { %890 = vmatpush.msrb.mxu2 %v1226_v8  ;;  %910 = vmatpush.msrb.mxu3 %v1216_v4  ;;  %v247_v4 = vpop.f32.mrf.mxu0 }
 0x45e   :  { %v248_v5 = vadd.f32 %v247_v4, %v1390_v40 }
 0x45f   :  { %891 = vmatpush.msrb.mxu2 %v1240_v13  ;;  %911 = vmatpush.msrb.mxu3 %v1224_v7 }
 0x461   :  { %892 = vmatpush.msrb.mxu2 %v1251_v17  ;;  %912 = vmatpush.msrb.mxu3 %v1238_v12 }
 0x463   :  { %893 = vmatpush.msrb.mxu2 %v1264_v21  ;;  %913 = vmatpush.msrb.mxu3 %v1243_v14  ;;  %v1025_v14 = vld [vmem:[%s1631_s6 + $0x8] sm:$0x3]  ;;  %v1026_v21 = vld [vmem:[%s1631_s6 + $0xa] sm:$0x3] }
 0x464   :  { %v112_v17 = vsel %vm48_vm0, %v1025_v14, %v1206_v0 }
 0x465   :  { %894 = vmatpush.msrb.mxu2 %v1277_v25  ;;  %914 = vmatpush.msrb.mxu3 %v1262_v20  ;;  %v117_v20 = vsel %vm53_vm1, %v112_v17, %v1206_v0 }
 0x466   :  { %1033 = vmatmul.msk.f32.gmra.mxu0 %vm196_vm2, %v117_v20  ;;  %1041 = vmatmul.msk.f32.gmra.mxu1 %vm196_vm2, %v117_v20 }
 0x467   :  { %895 = vmatpush.msrb.mxu2 %v1284_v27  ;;  %915 = vmatpush.msrb.mxu3 %v1275_v24  ;;  %v128_v24 = vsel %vm48_vm0, %v1026_v21, %v1206_v0 }
 0x468   :  { %v133_v27 = vsel %vm53_vm1, %v128_v24, %v1206_v0 }
 0x46e   :  { %1034 = vmatmul.msk.f32.gmra.mxu0 %vm196_vm2, %v133_v27  ;;  %1042 = vmatmul.msk.f32.gmra.mxu1 %vm196_vm2, %v133_v27 }
 0x476   :  { %1035 = vmatmul.msk.f32.gmra.mxu0 %vm196_vm2, %v149_v58  ;;  %1043 = vmatmul.msk.f32.gmra.mxu1 %vm196_vm2, %v149_v58 }
 0x47e   :  { %1036 = vmatmul.msk.f32.gmra.mxu0 %vm196_vm2, %v165_v23  ;;  %1044 = vmatmul.msk.f32.gmra.mxu1 %vm196_vm2, %v165_v23 }
 0x4db   :  { %v601_v1 = vpop.f32.mrf.mxu3  ;;  %v581_v6 = vpop.f32.mrf.mxu2 }
 0x4dc   :  { %v624_v2 = vadd.f32 %v1367_v36, %v601_v1  ;;  %v604_v7 = vadd.f32 %v581_v6, %v248_v5 }
 0x4de   :  { %626 = vrot.lane.b32.xlu0 %v624_v2, %s1157_s0  ;;  %v1054_v8 = vmul.f32 -1.442695, %v604_v7 }
 0x4e0   :  { %1093 = vpow2.f32 %v1054_v8 }
 0x4e3   :  { %v291_v0 = vpop.f32.mrf.mxu1  ;;  %v250_v39 = vpop.f32.mrf.mxu0 }
 0x4e4   :  { %v251_v45 = vadd.f32 %v250_v39, %v1390_v40  ;;  %v292_v14 = vadd.f32 %v291_v0, %v1405_v63 }
 0x4e6   :  { %v1094_v12 = vpop.eup %1093 }
 0x4e7   :  { %v608_v13 = vadd.f32 1.0, %v1094_v12 }
 0x4e9   :  { %1095 = vrcp.f32 %v608_v13  ;;  %v620_v61 = vand.u32 2147483648, %v608_v13  ;;  %vm614_vm4 = vweird.f32 %v608_v13  ;;  %v618_v62 = vand.u32 2147483647, %v608_v13 }
 0x4eb   :  { %v621_v9 = vor.u32 1.1754944e-38, %v620_v61  ;;  %vm619_vm6 = vcmp.eq.f32.partialorder %v618_v62, 8.507059e+37  ;;  %v1550_v16 = vpop.f32.mrf.mxu1  ;;  %v253_v42 = vpop.f32.mrf.mxu0 }
 0x4ec   :  { %v254_v58 = vadd.f32 %v253_v42, %v1390_v40 }
 0x4ef   :  { %v1096_v25 = vpop.eup %1095 }
 0x4f0   :  { %v610_v54 = vmul.f32 %v1096_v25, %v608_v13  ;;  %vm615_vm3 = vweird.f32 %v1096_v25 }
 0x4f1   :  { %vm616_vm5 = vmor %vm614_vm4, %vm615_vm3 }
 0x4f2   :  { %v611_v57 = vsub.f32 1.0, %v610_v54 }
 0x4f3   :  { %v1552_v35 = vpop.f32.mrf.mxu1  ;;  %v1558_v43 = vpop.f32.mrf.mxu0 }
 0x4f4   :  { %v612_v59 = vmul.f32 %v1096_v25, %v611_v57 }
 0x4f6   :  { %v613_v60 = vadd.f32 %v1096_v25, %v612_v59 }
 0x4f8   :  { %v617_v3 = vsel %vm616_vm5, %v1096_v25, %v613_v60 }
 0x4f9   :  { %v622_v15 = vsel %vm619_vm6, %v621_v9, %v617_v3 }
 0x4fa   :  { %v636_v31 = vsub.f32 1.0, %v622_v15  ;;  %v638_v33 = vmul.f32 %v622_v15, %v1476_v53 }
 0x4fb   :  { %v1554_v37 = vpop.f32.mrf.mxu1  ;;  %v1560_v44 = vpop.f32.mrf.mxu0 }
 0x550   :  { %v627_v11 = vpop.permute.xlu0 %626 }
 0x551   :  { %v629_v18 = vmul.f32 %v627_v11, %v622_v15 }
 0x553   :  { %631 = vrot.lane.b32.xlu1 %v629_v18, %s1157_s0 }
 0x5c5   :  { %v632_v29 = vpop.permute.xlu1 %631 }
 0x5c6   :  { %v634_v30 = vadd.f32 %v632_v29, %v289_v28 }
 0x5c8   :  { %1097 = vtanh.f32 %v634_v30 }
 0x5ce   :  { %v1098_v32 = vpop.eup %1097 }
 0x5cf   :  { %v637_v10 = vmul.f32 %v1098_v32, %v636_v31  ;;  %v295_v31 = vadd.f32 %v1550_v16, %v1405_v63  ;;  %v257_v16 = vadd.f32 %v1558_v43, %v1390_v40 }
 0x5d1   :  { %v639_v34 = vadd.f32 %v638_v33, %v637_v10 }
 0x5d3   :  { %1055 = vmatmul.msk.f32.vlgmr.msrb.gmra.mxu0 %vm323_vm7, %v639_v34  ;;  %1056 = vmatmul.msk.f32.vlgmr.msrb.gmra.mxu1 %vm323_vm7, %v639_v34 }
 0x650   :  { %v680_v38 = vpop.f32.mrf.mxu1  ;;  %v660_v46 = vpop.f32.mrf.mxu0 }
 0x651   :  { %v703_v41 = vadd.f32 %v1367_v36, %v680_v38  ;;  %v683_v47 = vadd.f32 %v660_v46, %v251_v45 }
 0x653   :  { %705 = vrot.lane.b32.xlu2 %v703_v41, %s1157_s0  ;;  %v1057_v48 = vmul.f32 -1.442695, %v683_v47 }
 0x655   :  { %1099 = vpow2.f32 %v1057_v48 }
 0x65b   :  { %v1100_v49 = vpop.eup %1099 }
 0x65c   :  { %v687_v50 = vadd.f32 1.0, %v1100_v49 }
 0x65e   :  { %1101 = vrcp.f32 %v687_v50  ;;  %v699_v4 = vand.u32 2147483648, %v687_v50  ;;  %vm693_vm1 = vweird.f32 %v687_v50  ;;  %v697_v5 = vand.u32 2147483647, %v687_v50 }
 0x660   :  { %v700_v7 = vor.u32 1.1754944e-38, %v699_v4  ;;  %vm698_vm8 = vcmp.eq.f32.partialorder %v697_v5, 8.507059e+37 }
 0x664   :  { %v1102_v51 = vpop.eup %1101 }
 0x665   :  { %v689_v52 = vmul.f32 %v1102_v51, %v687_v50  ;;  %vm694_vm0 = vweird.f32 %v1102_v51 }
 0x666   :  { %vm695_vm2 = vmor %vm693_vm1, %vm694_vm0  ;;  %vm991_vm1 = vcmask 64512  }
 0x667   :  { %v690_v53 = vsub.f32 1.0, %v689_v52 }
 0x669   :  { %v691_v1 = vmul.f32 %v1102_v51, %v690_v53 }
 0x66b   :  { %v692_v2 = vadd.f32 %v1102_v51, %v691_v1 }
 0x66d   :  { %v696_v6 = vsel %vm695_vm2, %v1102_v51, %v692_v2 }
 0x66e   :  { %v701_v12 = vsel %vm698_vm8, %v700_v7, %v696_v6 }
 0x66f   :  { %v715_v21 = vsub.f32 1.0, %v701_v12  ;;  %v717_v25 = vmul.f32 %v701_v12, %v639_v34 }
 0x6ad   :  { %v706_v8 = vpop.permute.xlu2 %705 }
 0x6ae   :  { %v708_v13 = vmul.f32 %v706_v8, %v701_v12  ;;  %v298_v12 = vadd.f32 %v1552_v35, %v1405_v63  ;;  %v260_v35 = vadd.f32 %v1560_v44, %v1390_v40 }
 0x6b0   :  { %710 = vrot.lane.b32.xlu0 %v708_v13, %s1157_s0 }
 0x722   :  { %v711_v17 = vpop.permute.xlu0 %710 }
 0x723   :  { %v713_v20 = vadd.f32 %v711_v17, %v292_v14 }
 0x725   :  { %1103 = vtanh.f32 %v713_v20 }
 0x72b   :  { %v1104_v24 = vpop.eup %1103 }
 0x72c   :  { %v716_v27 = vmul.f32 %v1104_v24, %v715_v21 }
 0x72e   :  { %v718_v54 = vadd.f32 %v717_v25, %v716_v27 }
 0x730   :  { %1058 = vmatmul.msk.f32.vlgmr.msra.gmra.mxu2 %vm323_vm7, %v718_v54  ;;  %1059 = vmatmul.msk.f32.vlgmr.msra.gmra.mxu3 %vm323_vm7, %v718_v54 }
 0x7b3   :  { %v759_v55 = vpop.f32.mrf.mxu3  ;;  %v739_v57 = vpop.f32.mrf.mxu2 }
 0x7b4   :  { %v782_v56 = vadd.f32 %v1367_v36, %v759_v55  ;;  %v762_v59 = vadd.f32 %v739_v57, %v254_v58 }
 0x7b6   :  { %784 = vrot.lane.b32.xlu1 %v782_v56, %s1157_s0  ;;  %v1060_v60 = vmul.f32 -1.442695, %v762_v59 }
 0x7b8   :  { %1105 = vpow2.f32 %v1060_v60  ;;  %v963_v60 = vld [vmem:[%s1629_s4 + $0x38] sm:$0xff] }
 0x7b9   :  { %979 = vmatpush.msrb.mxu0 %v963_v60 }
 0x7be   :  { %v1106_v61 = vpop.eup %1105 }
 0x7bf   :  { %v766_v62 = vadd.f32 1.0, %v1106_v61 }
 0x7c1   :  { %1107 = vrcp.f32 %v766_v62  ;;  %v778_v19 = vand.u32 2147483648, %v766_v62  ;;  %vm772_vm10 = vweird.f32 %v766_v62  ;;  %v776_v22 = vand.u32 2147483647, %v766_v62 }
 0x7c3   :  { %v779_v26 = vor.u32 1.1754944e-38, %v778_v19  ;;  %vm777_vm12 = vcmp.eq.f32.partialorder %v776_v22, 8.507059e+37 }
 0x7c7   :  { %v1108_v3 = vpop.eup %1107 }
 0x7c8   :  { %v768_v9 = vmul.f32 %v1108_v3, %v766_v62  ;;  %vm773_vm9 = vweird.f32 %v1108_v3 }
 0x7c9   :  { %vm774_vm11 = vmor %vm772_vm10, %vm773_vm9 }
 0x7ca   :  { %v769_v11 = vsub.f32 1.0, %v768_v9 }
 0x7cc   :  { %v770_v15 = vmul.f32 %v1108_v3, %v769_v11 }
 0x7ce   :  { %v771_v18 = vadd.f32 %v1108_v3, %v770_v15 }
 0x7d0   :  { %v775_v23 = vsel %vm774_vm11, %v1108_v3, %v771_v18 }
 0x7d1   :  { %v780_v29 = vsel %vm777_vm12, %v779_v26, %v775_v23  ;;  %v962_v23 = vld [vmem:[%s1629_s4 + $0x30] sm:$0xff]  ;;  %v961_v26 = vld [vmem:[%s1629_s4 + $0x28] sm:$0xff] }
 0x7d2   :  { %v794_v10 = vsub.f32 1.0, %v780_v29  ;;  %v796_v0 = vmul.f32 %v780_v29, %v718_v54  ;;  %980 = vmatpush.msrb.mxu0 %v962_v23 }
 0x7d4   :  { %981 = vmatpush.msrb.mxu0 %v961_v26 }
 0x828   :  { %v785_v28 = vpop.permute.xlu1 %784 }
 0x829   :  { %v787_v30 = vmul.f32 %v785_v28, %v780_v29  ;;  %v960_v28 = vld [vmem:[%s1629_s4 + $0x20] sm:$0xff]  ;;  %v959_v29 = vld [vmem:[%s1629_s4 + $0x18] sm:$0xff] }
 0x82a   :  { %982 = vmatpush.msrb.mxu0 %v960_v28 }
 0x82b   :  { %789 = vrot.lane.b32.xlu2 %v787_v30, %s1157_s0  ;;  %v958_v30 = vld [vmem:[%s1629_s4 + $0x10] sm:$0xff] }
 0x82c   :  { %983 = vmatpush.msrb.mxu0 %v959_v29 }
 0x82e   :  { %984 = vmatpush.msrb.mxu0 %v958_v30 }
 0x885   :  { %v790_v32 = vpop.permute.xlu2 %789 }
 0x886   :  { %v792_v33 = vadd.f32 %v790_v32, %v295_v31  ;;  %v957_v31 = vld [vmem:[%s1629_s4 + $0x8] sm:$0xff]  ;;  %v956_v32 = vld [vmem:[%s1629_s4] sm:$0xff] }
 0x887   :  { %985 = vmatpush.msrb.mxu0 %v957_v31 }
 0x888   :  { %1109 = vtanh.f32 %v792_v33  ;;  %v301_v33 = vadd.f32 %v1554_v37, %v1405_v63 }
 0x889   :  { %986 = vmatpush.msrb.mxu0 %v956_v32 }
 0x88e   :  { %v1110_v34 = vpop.eup %1109 }
 0x88f   :  { %v795_v38 = vmul.f32 %v1110_v34, %v794_v10 }
 0x891   :  { %v797_v39 = vadd.f32 %v796_v0, %v795_v38 }
 0x893   :  { %1061 = vmatmul.msk.f32.vlgmr.msra.gmra.mxu0 %vm323_vm7, %v797_v39  ;;  %1062 = vmatmul.msk.f32.vlgmr.msra.gmra.mxu1 %vm323_vm7, %v797_v39 }
 0x910   :  { %v838_v41 = vpop.f32.mrf.mxu1  ;;  %v818_v45 = vpop.f32.mrf.mxu0 }
 0x911   :  { %v861_v42 = vadd.f32 %v1367_v36, %v838_v41  ;;  %v841_v46 = vadd.f32 %v818_v45, %v257_v16  ;;  %v1074_v45 = vld [vmem:[%s1630_s5] ss:$0 sm:$0xff] }
 0x913   :  { %863 = vrot.lane.b32.xlu0 %v861_v42, %s1157_s0  ;;  %v1063_v47 = vmul.f32 -1.442695, %v841_v46 }
 0x915   :  { %1111 = vpow2.f32 %v1063_v47 }
 0x91b   :  { %v1112_v48 = vpop.eup %1111 }
 0x91c   :  { %v845_v49 = vadd.f32 1.0, %v1112_v48 }
 0x91e   :  { %1113 = vrcp.f32 %v845_v49  ;;  %v857_v2 = vand.u32 2147483648, %v845_v49  ;;  %vm851_vm14 = vweird.f32 %v845_v49  ;;  %v855_v4 = vand.u32 2147483647, %v845_v49 }
 0x920   :  { %v858_v6 = vor.u32 1.1754944e-38, %v857_v2  ;;  %vm856_vm3 = vcmp.eq.f32.partialorder %v855_v4, 8.507059e+37 }
 0x924   :  { %v1114_v50 = vpop.eup %1113 }
 0x925   :  { %v847_v51 = vmul.f32 %v1114_v50, %v845_v49  ;;  %vm852_vm13 = vweird.f32 %v1114_v50 }
 0x926   :  { %vm853_vm15 = vmor %vm851_vm14, %vm852_vm13 }
 0x927   :  { %v848_v52 = vsub.f32 1.0, %v847_v51 }
 0x929   :  { %v849_v53 = vmul.f32 %v1114_v50, %v848_v52 }
 0x92b   :  { %v850_v1 = vadd.f32 %v1114_v50, %v849_v53 }
 0x92d   :  { %v854_v5 = vsel %vm853_vm15, %v1114_v50, %v850_v1 }
 0x92e   :  { %v859_v7 = vsel %vm856_vm3, %v858_v6, %v854_v5 }
 0x92f   :  { %v873_v17 = vsub.f32 1.0, %v859_v7  ;;  %v875_v21 = vmul.f32 %v859_v7, %v797_v39 }
 0x985   :  { %v864_v43 = vpop.permute.xlu0 %863 }
 0x986   :  { %v866_v8 = vmul.f32 %v864_v43, %v859_v7 }
 0x988   :  { %868 = vrot.lane.b32.xlu1 %v866_v8, %s1157_s0 }
 0x9fa   :  { %v869_v13 = vpop.permute.xlu1 %868 }
 0x9fb   :  { %v871_v14 = vadd.f32 %v869_v13, %v298_v12 }
 0x9fd   :  { %1115 = vtanh.f32 %v871_v14 }
 0xa03   :  { %v1116_v20 = vpop.eup %1115 }
 0xa04   :  { %v874_v24 = vmul.f32 %v1116_v20, %v873_v17 }
 0xa06   :  { %v876_v25 = vadd.f32 %v875_v21, %v874_v24 }
 0xa08   :  { %1064 = vmatmul.msk.f32.vlgmr.msrb.gmra.mxu2 %vm323_vm7, %v876_v25  ;;  %1065 = vmatmul.msk.f32.vlgmr.msrb.gmra.mxu3 %vm323_vm7, %v876_v25 }
 0xa8b   :  { %v917_v27 = vpop.f32.mrf.mxu3  ;;  %v897_v55 = vpop.f32.mrf.mxu2 }
 0xa8c   :  { %v940_v54 = vadd.f32 %v1367_v36, %v917_v27  ;;  %v920_v56 = vadd.f32 %v897_v55, %v260_v35 }
 0xa8e   :  { %942 = vrot.lane.b32.xlu2 %v940_v54, %s1157_s0  ;;  %v1066_v57 = vmul.f32 -1.442695, %v920_v56 }
 0xa90   :  { %1117 = vpow2.f32 %v1066_v57 }
 0xa96   :  { %v1118_v58 = vpop.eup %1117 }
 0xa97   :  { %v924_v59 = vadd.f32 1.0, %v1118_v58 }
 0xa99   :  { %1119 = vrcp.f32 %v924_v59  ;;  %v936_v11 = vand.u32 2147483648, %v924_v59  ;;  %vm930_vm5 = vweird.f32 %v924_v59  ;;  %v934_v40 = vand.u32 2147483647, %v924_v59 }
 0xa9b   :  { %v937_v15 = vor.u32 1.1754944e-38, %v936_v11  ;;  %vm935_vm0 = vcmp.eq.f32.partialorder %v934_v40, 8.507059e+37 }
 0xa9f   :  { %v1120_v61 = vpop.eup %1119 }
 0xaa0   :  { %v926_v62 = vmul.f32 %v1120_v61, %v924_v59  ;;  %vm931_vm4 = vweird.f32 %v1120_v61 }
 0xaa1   :  { %vm932_vm6 = vmor %vm930_vm5, %vm931_vm4 }
 0xaa2   :  { %v927_v36 = vsub.f32 1.0, %v926_v62 }
 0xaa4   :  { %v928_v3 = vmul.f32 %v1120_v61, %v927_v36 }
 0xaa6   :  { %v929_v9 = vadd.f32 %v1120_v61, %v928_v3 }
 0xaa8   :  { %v933_v44 = vsel %vm932_vm6, %v1120_v61, %v929_v9 }
 0xaa9   :  { %v938_v19 = vsel %vm935_vm0, %v937_v15, %v933_v44 }
 0xaaa   :  { %v952_v0 = vsub.f32 1.0, %v938_v19  ;;  %v954_v39 = vmul.f32 %v938_v19, %v876_v25 }
 0xae8   :  { %v943_v18 = vpop.permute.xlu2 %942 }
 0xae9   :  { %v945_v22 = vmul.f32 %v943_v18, %v938_v19 }
 0xaeb   :  { %947 = vrot.lane.b32.xlu0 %v945_v22, %s1157_s0 }
 0xb5d   :  { %v948_v10 = vpop.permute.xlu0 %947 }
 0xb5e   :  { %v950_v34 = vadd.f32 %v948_v10, %v301_v33 }
 0xb60   :  { %1121 = vtanh.f32 %v950_v34 }
 0xb66   :  { %v1122_v38 = vpop.eup %1121 }
 0xb67   :  { %v953_v41 = vmul.f32 %v1122_v38, %v952_v0 }
 0xb69   :  { %v955_v42 = vadd.f32 %v954_v39, %v953_v41 }
 0xb6b   :  { %1067 = vmatmul.msk.f32.vlgmr.msrb.gmra.mxu0 %vm323_vm7, %v955_v42 }
 0xbe8   :  { %v988_v16 = vpop.f32.mrf.mxu0 }
 0xbe9   :  { %v989_v46 = vadd.f32 %v1074_v45, %v988_v16 }
 0xbeb   :  { %v992_v47 = vsel %vm991_vm1, %v989_v46, -inf }
 0xbec   :  { %993 = vmax.xlane.f32.xlu1 %v992_v47 }
 0xc5f   :  { %v994_v63 = vpop.xlane.xlu1 %993 }
 0xc60   :  { %v995_v37 = vsub.f32 %v989_v46, %v994_v63 }
 0xc62   :  { %v996_v48 = vmul.f32 1.442695, %v995_v37 }
 0xc64   :  { %1123 = vpow2.f32 %v996_v48 }
 0xc6a   :  { %v1124_v49 = vpop.eup %1123 }
 0xc6b   :  { %v998_v50 = vsel %vm991_vm1, %v1124_v49, 0.0 }
 0xc6c   :  { %999 = vadd.xlane.f32.xlu2 %v998_v50 }
 0xcdf   :  { %v1000_v51 = vpop.xlane.xlu2 %999 }
 0xce0   :  { %1125 = vrcp.f32 %v1000_v51  ;;  %v1012_v2 = vand.u32 2147483648, %v1000_v51  ;;  %v1010_v5 = vand.u32 2147483647, %v1000_v51  ;;  %vm1006_vm2 = vweird.f32 %v1000_v51 }
 0xce2   :  { %v1013_v43 = vor.u32 1.1754944e-38, %v1012_v2  ;;  %vm1011_vm9 = vcmp.eq.f32.partialorder %v1010_v5, 8.507059e+37 }
 0xce6   :  { %v1126_v52 = vpop.eup %1125 }
 0xce7   :  { %v1002_v53 = vmul.f32 %v1126_v52, %v1000_v51  ;;  %vm1007_vm7 = vweird.f32 %v1126_v52 }
 0xce8   :  { %vm1008_vm8 = vmor %vm1006_vm2, %vm1007_vm7 }
 0xce9   :  { %v1003_v1 = vsub.f32 1.0, %v1002_v53 }
 0xceb   :  { %v1004_v4 = vmul.f32 %v1126_v52, %v1003_v1 }
 0xced   :  { %v1005_v6 = vadd.f32 %v1126_v52, %v1004_v4 }
 0xcef   :  { %v1009_v7 = vsel %vm1008_vm8, %v1126_v52, %v1005_v6 }
 0xcf0   :  { %v1014_v8 = vsel %vm1011_vm9, %v1013_v43, %v1009_v7 }
 0xcf1   :  { %v1015_v12 = vmul.f32 %v1124_v49, %v1014_v8 }
 0xcf3   :  { %1016 = vst.msk [vmem:[%s1633_s8] sm:$0xff] %vm991_vm1, %v1015_v12 }
 0xcf4   :  { %1021 = vsyncpa [#allocation8], 1 }

</bundles_post_ra>
